<compile_context>
chip_gen: v7x
topology: tpu7x:2x2x1
jax: 0.10.0
libtpu: 0.0.40
codegen_flags: <defaults>
</compile_context>

<pallas_src>
from functools import partial

import jax
import jax.numpy as jnp
from jax.experimental import pallas as pl
from jax.experimental.pallas import tpu as pltpu

_LANE = 128
_SUBLANE = 8


def _round_up(n, m):
    return ((n + m - 1) // m) * m


def _mlp_kernel(x_ref, w1_ref, b1_ref, w2_ref, b2_ref, o_ref):
    # hidden = sigmoid(x @ w1 + b1): MXU matmul (f32 accumulate), bias add on VPU,
    # sigmoid's exp/recip on the EUP (separate bundle slot).
    h = jnp.dot(x_ref[...], w1_ref[...], preferred_element_type=jnp.float32)
    h = jax.nn.sigmoid(h + b1_ref[...])          # (B, Hp) + (1, Hp) broadcast
    # out = hidden @ w2 + b2
    o_ref[...] = (
        jnp.dot(h, w2_ref[...], preferred_element_type=jnp.float32) + b2_ref[...]
    )


@partial(jax.jit, static_argnames=("batch_tile",))
def net_forward(x, w1, b1, w2, b2, *, batch_tile=512):
    """x: (B, n_feature) f32 -> (B, n_output) f32."""
    x = x.astype(jnp.float32)
    B, F = x.shape
    H = w1.shape[1]
    O = w2.shape[1]

    # ---- lane-dense padding of hidden / output dims (multiples of 128) ----
    Hp = _round_up(H, _LANE)
    Op = _round_up(O, _LANE)
    w1p = jnp.zeros((F, Hp), jnp.float32).at[:, :H].set(w1.astype(jnp.float32))
    b1p = jnp.zeros((1, Hp), jnp.float32).at[:, :H].set(b1.astype(jnp.float32))
    w2p = jnp.zeros((Hp, Op), jnp.float32).at[:H, :O].set(w2.astype(jnp.float32))
    b2p = jnp.zeros((1, Op), jnp.float32).at[:, :O].set(b2.astype(jnp.float32))

    if B <= batch_tile:
        # Small problem: single shot, everything resident in VMEM, no grid at all.
        cost = pl.CostEstimate(
            flops=2 * B * F * Hp + 2 * B * Hp * Op,
            transcendentals=B * Hp,
            bytes_accessed=4 * (B * F + F * Hp + Hp + Hp * Op + Op + B * Op),
        )
        out_p = pl.pallas_call(
            _mlp_kernel,
            out_shape=jax.ShapeDtypeStruct((B, Op), jnp.float32),
            in_specs=[pl.BlockSpec(memory_space=pltpu.MemorySpace.VMEM)] * 5,
            out_specs=pl.BlockSpec(memory_space=pltpu.MemorySpace.VMEM),
            cost_estimate=cost,
        )(x, w1p, b1p, w2p, b2p)
    else:
        # Large batch: tile only the batch axis; weights/biases stay VMEM-resident
        # (same block index every step -> no re-DMA).  Batch axis is "parallel"
        # so Mosaic can shard it across v7x's two TensorCores.
        TB = _round_up(batch_tile, _SUBLANE)          # sublane-aligned batch tile
        Bp = _round_up(B, TB)
        xp = x if Bp == B else jnp.zeros((Bp, F), jnp.float32).at[:B, :].set(x)
        cost = pl.CostEstimate(
            flops=2 * Bp * F * Hp + 2 * Bp * Hp * Op,
            transcendentals=Bp * Hp,
            bytes_accessed=4 * (Bp * F + F * Hp + Hp + Hp * Op + Op + Bp * Op),
        )
        out_p = pl.pallas_call(
            _mlp_kernel,
            out_shape=jax.ShapeDtypeStruct((Bp, Op), jnp.float32),
            grid_spec=pltpu.PrefetchScalarGridSpec(
                num_scalar_prefetch=0,
                grid=(Bp // TB,),
                in_specs=[
                    pl.BlockSpec((TB, F), lambda i: (i, 0)),
                    pl.BlockSpec((F, Hp), lambda i: (0, 0)),
                    pl.BlockSpec((1, Hp), lambda i: (0, 0)),
                    pl.BlockSpec((Hp, Op), lambda i: (0, 0)),
                    pl.BlockSpec((1, Op), lambda i: (0, 0)),
                ],
                out_specs=pl.BlockSpec((TB, Op), lambda i: (i, 0)),
            ),
            compiler_params=pltpu.CompilerParams(
                dimension_semantics=("parallel",),
                vmem_limit_bytes=96 * 1024 * 1024,
            ),
            cost_estimate=cost,
        )(xp, w1p, b1p, w2p, b2p)
        out_p = out_p[:B]

    return out_p[:, :O]


def init_params(key, n_feature, n_hidden, n_output):
    """Deterministic init mimicking PyTorch Linear's U(-1/sqrt(fan_in), 1/sqrt(fan_in))."""
    k1, k2, k3, k4 = jax.random.split(key, 4)
    s1 = 1.0 / jnp.sqrt(n_feature)
    s2 = 1.0 / jnp.sqrt(n_hidden)
    w1 = jax.random.uniform(k1, (n_feature, n_hidden), jnp.float32, -s1, s1)
    b1 = jax.random.uniform(k2, (n_hidden,), jnp.float32, -s1, s1)
    w2 = jax.random.uniform(k3, (n_hidden, n_output), jnp.float32, -s2, s2)
    b2 = jax.random.uniform(k4, (n_output,), jnp.float32, -s2, s2)
    return w1, b1, w2, b2


def net_forward_ref(x, w1, b1, w2, b2):
    h = jax.nn.sigmoid(x @ w1 + b1)
    return h @ w2 + b2


if __name__ == "__main__":
    # Small shapes consistent with Net(n_feature, n_hidden, n_output)
    batch, n_feature, n_hidden, n_output = 8, 64, 32, 16

    key = jax.random.PRNGKey(0)
    kx, kp = jax.random.split(key)
    x = jax.random.normal(kx, (batch, n_feature), dtype=jnp.float32)
    w1, b1, w2, b2 = init_params(kp, n_feature, n_hidden, n_output)

    # Path 1: single-shot (no grid) kernel.
    out = jax.block_until_ready(net_forward(x, w1, b1, w2, b2))
    ref = net_forward_ref(x, w1, b1, w2, b2)
    assert out.shape == (batch, n_output)
    assert jnp.allclose(out, ref, atol=1e-5, rtol=1e-5)

    # Path 2: batch-tiled kernel (resident weights, parallel batch axis), exercised
    # with a tiny tile so it runs at demo sizes too.
    x2 = jax.random.normal(jax.random.PRNGKey(1), (24, n_feature), dtype=jnp.float32)
    out2 = jax.block_until_ready(net_forward(x2, w1, b1, w2, b2, batch_tile=8))
    ref2 = net_forward_ref(x2, w1, b1, w2, b2)
    assert out2.shape == (24, n_output)
    assert jnp.allclose(out2, ref2, atol=1e-5, rtol=1e-5)

    print("KERNEL_OK")
</pallas_src>

<mosaic_0001>
module attributes {stable_mosaic.version = 11 : i64} {
  func.func @_mlp_kernel(%arg0: memref<8x64xf32, #tpu.memory_space<vmem>>, %arg1: memref<64x128xf32, #tpu.memory_space<vmem>>, %arg2: memref<1x128xf32, #tpu.memory_space<vmem>>, %arg3: memref<128x128xf32, #tpu.memory_space<vmem>>, %arg4: memref<1x128xf32, #tpu.memory_space<vmem>>, %arg5: memref<8x128xf32, #tpu.memory_space<vmem>>) attributes {dimension_semantics = [], scalar_prefetch = 0 : i64, scratch_operands = 0 : i64, tpu.core_type = #tpu.core_type<tc>} {
    %c0 = arith.constant 0 : index
    %c0_0 = arith.constant 0 : index
    %0 = vector.load %arg0[%c0, %c0_0] : memref<8x64xf32, #tpu.memory_space<vmem>>, vector<8x64xf32>
    %c0_1 = arith.constant 0 : index
    %c0_2 = arith.constant 0 : index
    %1 = vector.load %arg1[%c0_1, %c0_2] : memref<64x128xf32, #tpu.memory_space<vmem>>, vector<64x128xf32>
    %cst = arith.constant dense<0.000000e+00> : vector<8x128xf32>
    %2 = tpu.matmul %0, %1, %cst {dimension_numbers = #tpu.dot_dimension_numbers<[1], [0], [0], [1], [0, 0, 1, 1], [], []>} : vector<8x64xf32>, vector<64x128xf32>, vector<8x128xf32> -> vector<8x128xf32>
    %c0_3 = arith.constant 0 : index
    %c0_4 = arith.constant 0 : index
    %3 = vector.load %arg2[%c0_3, %c0_4] : memref<1x128xf32, #tpu.memory_space<vmem>>, vector<1x128xf32>
    %4 = vector.broadcast %3 : vector<1x128xf32> to vector<8x128xf32>
    %5 = arith.addf %2, %4 : vector<8x128xf32>
    %6 = arith.negf %5 : vector<8x128xf32>
    %7 = math.exp %6 : vector<8x128xf32>
    %cst_5 = arith.constant 1.000000e+00 : f32
    %8 = vector.broadcast %cst_5 : f32 to vector<8x128xf32>
    %9 = arith.addf %8, %7 : vector<8x128xf32>
    %10 = arith.divf %8, %9 : vector<8x128xf32>
    %c0_6 = arith.constant 0 : index
    %c0_7 = arith.constant 0 : index
    %11 = vector.load %arg3[%c0_6, %c0_7] : memref<128x128xf32, #tpu.memory_space<vmem>>, vector<128x128xf32>
    %cst_8 = arith.constant dense<0.000000e+00> : vector<8x128xf32>
    %12 = tpu.matmul %10, %11, %cst_8 {dimension_numbers = #tpu.dot_dimension_numbers<[1], [0], [0], [1], [0, 0, 1, 1], [], []>} : vector<8x128xf32>, vector<128x128xf32>, vector<8x128xf32> -> vector<8x128xf32>
    %c0_9 = arith.constant 0 : index
    %c0_10 = arith.constant 0 : index
    %13 = vector.load %arg4[%c0_9, %c0_10] : memref<1x128xf32, #tpu.memory_space<vmem>>, vector<1x128xf32>
    %14 = vector.broadcast %13 : vector<1x128xf32> to vector<8x128xf32>
    %15 = arith.addf %12, %14 : vector<8x128xf32>
    %c0_11 = arith.constant 0 : index
    %c0_12 = arith.constant 0 : index
    %16 = vector.load %arg5[%c0_11, %c0_12] : memref<8x128xf32, #tpu.memory_space<vmem>>, vector<8x128xf32>
    tpu.vector_store %arg5[%c0_11, %c0_12], %15 {strides = array<i32>} : memref<8x128xf32, #tpu.memory_space<vmem>>, vector<8x128xf32>,
    return
  }
}

</mosaic_0001>

<bundles_post_ra>
// kernel: net_forward.1
= control target key start
LH: loop header
LB: loop body
LE: loop exit
PB: predicated region body
PF: predicated region fallthrough
CT: control target
= control target key end

     0   :  { %v377_v3 = vmov 0.0|0.0   ;;  %vm378_vm0 = vmmov 0   ;;  %v379_v6 = vmov 0.0   ;;  %s516_s0 = inlined_call_operand.vmem [shape: f32[8,64], index: 0, kind: input, shape index: {}]   ;;  %s517_s1 = inlined_call_operand.vmem [shape: f32[64,128], index: 1, kind: input, shape index: {}]   ;;  %s518_s2 = inlined_call_operand.vmem [shape: f32[1,128], index: 2, kind: input, shape index: {}]   ;;  %s519_s3 = inlined_call_operand.vmem [shape: f32[128,128], index: 3, kind: input, shape index: {}]   ;;  %s520_s4 = inlined_call_operand.vmem [shape: f32[1,128], index: 4, kind: input, shape index: {}]   ;;  %s521_s5 = inlined_call_operand.hbm [shape: f32[8,128], index: 5, kind: output, shape index: {}]  }
   0x1   :  { %v22_v0 = vld [vmem:[%s517_s1] sm:$0xff]  ;;  %v23_v1 = vld [vmem:[%s517_s1 + $0x8] sm:$0xff]  ;;  %v24_v2 = vld [vmem:[%s517_s1 + $0x10] sm:$0xff]  ;;  %309 = vmatprep.subr.bf16.mxu0 %v377_v3  ;;  %271 = vmatprep.mubr.msk.f32.mxu0 %vm378_vm0, %v379_v6 }
   0x2   :  { %v310_v4 = vpack.c.bf16 %v23_v1, %v22_v0  ;;  %v25_v5 = vld [vmem:[%s517_s1 + $0x18] sm:$0xff]  ;;  %321 = vmatprep.subr.bf16.mxu1 %v377_v3  ;;  %306 = vmatprep.mubr.msk.f32.mxu1 %vm378_vm0, %v379_v6  ;;  %v117_v8 = vld [vmem:[%s519_s3] sm:$0xff]  ;;  %v118_v9 = vld [vmem:[%s519_s3 + $0x8] sm:$0xff] }
   0x3   :  { %v313_v7 = vpack.c.bf16 %v25_v5, %v24_v2  ;;  %v26_v10 = vld [vmem:[%s517_s1 + $0x20] sm:$0xff]  ;;  %v27_v11 = vld [vmem:[%s517_s1 + $0x28] sm:$0xff]  ;;  %v322_v12 = vpack.c.bf16 %v118_v9, %v117_v8 }
   0x4   :  { %311 = vmatpush3.bf16.msra.mxu0 %v310_v4 }
   0x5   :  { %312 = vmatprep.subr.bf16.mxu0 %v377_v3 }
   0x6   :  { %10 = vsyncpa [#allocation3], 0  ;;  %323 = vmatpush3.bf16.msra.mxu1 %v322_v12  ;;  %v316_v13 = vpack.c.bf16 %v27_v11, %v26_v10  ;;  %v28_v14 = vld [vmem:[%s517_s1 + $0x30] sm:$0xff]  ;;  %v29_v15 = vld [vmem:[%s517_s1 + $0x38] sm:$0xff]  ;;  %vm37_vm1 = vcmask 523264   ;;  %s380_s1 = smov [#allocation2]  }
   0x7   :  { %324 = vmatprep.subr.bf16.mxu1 %v377_v3  ;;  %v319_v16 = vpack.c.bf16 %v29_v15, %v28_v14  ;;  %v21_v17 = vld [vmem:[%s516_s0] sm:$0xff]  ;;  %v119_v18 = vld [vmem:[%s519_s3 + $0x10] sm:$0xff]  ;;  %v120_v19 = vld [vmem:[%s519_s3 + $0x18] sm:$0xff]  ;;  %s217_s19 = sshll.u32 %s380_s1, 4  ;;  %s218_s19 = int_to_ptr.vmem [resolvable:$true] %s217_s19 }
   0x8   :  { %314 = vmatpush3.bf16.msra.mxu0 %v313_v7  ;;  %v325_v20 = vpack.c.bf16 %v120_v19, %v119_v18  ;;  %v121_v21 = vld [vmem:[%s519_s3 + $0x20] sm:$0xff]  ;;  %v122_v22 = vld [vmem:[%s519_s3 + $0x28] sm:$0xff]  ;;  %v123_v24 = vld [vmem:[%s519_s3 + $0x30] sm:$0xff]  ;;  %p358_p1 = scmp.lt.s32.totalorder %s218_s19, %s218_s19 }
   0x9   :  { %315 = vmatprep.subr.bf16.mxu0 %v377_v3  ;;  %v328_v23 = vpack.c.bf16 %v122_v22, %v121_v21  ;;  %v124_v25 = vld [vmem:[%s519_s3 + $0x38] sm:$0xff]  ;;  %v125_v27 = vld [vmem:[%s519_s3 + $0x40] sm:$0xff]  ;;  %v126_v28 = vld [vmem:[%s519_s3 + $0x48] sm:$0xff] }
   0xa   :  { %326 = vmatpush3.bf16.msra.mxu1 %v325_v20  ;;  %v331_v26 = vpack.c.bf16 %v124_v25, %v123_v24  ;;  %v334_v29 = vpack.c.bf16 %v126_v28, %v125_v27  ;;  %v127_v30 = vld [vmem:[%s519_s3 + $0x50] sm:$0xff]  ;;  %v128_v31 = vld [vmem:[%s519_s3 + $0x58] sm:$0xff]  ;;  %v129_v33 = vld [vmem:[%s519_s3 + $0x60] sm:$0xff] }
   0xb   :  { %327 = vmatprep.subr.bf16.mxu1 %v377_v3  ;;  %v337_v32 = vpack.c.bf16 %v128_v31, %v127_v30  ;;  %v130_v34 = vld [vmem:[%s519_s3 + $0x68] sm:$0xff]  ;;  %v131_v36 = vld [vmem:[%s519_s3 + $0x70] sm:$0xff]  ;;  %v132_v37 = vld [vmem:[%s519_s3 + $0x78] sm:$0xff] }
   0xc   :  { %317 = vmatpush3.bf16.msra.mxu0 %v316_v13  ;;  %v340_v35 = vpack.c.bf16 %v130_v34, %v129_v33  ;;  %v343_v38 = vpack.c.bf16 %v132_v37, %v131_v36  ;;  %v225_v39 = vld [vmem:[%s518_s2] ss:$0 sm:$0xff]  ;;  %s353_s2 = scalar_lea.vmem %s218_s19, 128 }
   0xd   :  { %318 = vmatprep.subr.bf16.mxu0 %v377_v3  ;;  %v228_v47 = vld [vmem:[%s520_s4] ss:$0 sm:$0xff]  ;;  %p354_p0 = scmp.ne.s32.totalorder %s218_s19, %s353_s2  ;;  %p359_p2 = scmp.lt.s32.totalorder %s353_s2, %s353_s2 }
   0xe   :  { %329 = vmatpush3.bf16.msra.mxu1 %v328_v23 }
   0xf   :  { %330 = vmatprep.subr.bf16.mxu1 %v377_v3  ;;  %p360_p3 = por %p359_p2, %p358_p1 }
  0x10   :  { %320 = vmatpush3.bf16.msra.mxu0 %v319_v16 }
  0x11   :  { %p361_p4 = pnand %p360_p3, %p354_p0 }
  0x12   :  { %332 = vmatpush3.bf16.msra.mxu1 %v331_v26 }
  0x13   :  { %272 = vmatmul.mubr.msk.f32.vlgmr.msra.gmra.mrb[0].mxu0 %vm37_vm1, %v21_v17  ;;  %333 = vmatprep.subr.bf16.mxu1 %v377_v3 }
  0x16   :  { %335 = vmatpush3.bf16.msra.mxu1 %v334_v29 }
  0x17   :  { %336 = vmatprep.subr.bf16.mxu1 %v377_v3 }
  0x1a   :  { %338 = vmatpush3.bf16.msra.mxu1 %v337_v32 }
  0x1b   :  { %339 = vmatprep.subr.bf16.mxu1 %v377_v3 }
  0x1e   :  { %341 = vmatpush3.bf16.msra.mxu1 %v340_v35 }
  0x1f   :  { %342 = vmatprep.subr.bf16.mxu1 %v377_v3 }
  0x22   :  { %344 = vmatpush3.bf16.msra.mxu1 %v343_v38 }
  0xe6   :  { %v107_v40 = vpop.f32.mrb[0].mxu0 }
  0xe7   :  { %v108_v41 = vadd.f32 %v225_v39, %v107_v40  ;;  %v273_v42 = vpop.f32.mrb[1].mxu0 }
  0xe9   :  { %v227_v43 = vmul.f32 -1.442695, %v108_v41 }
  0xeb   :  { %349 = vpow2.f32 %v227_v43 }
  0xf5   :  { %v350_v44 = vpop.eup %349 }
  0xf6   :  { %v114_v45 = vadd.f32 1.0, %v350_v44 }
  0xf8   :  { %351 = vrcp.f32 %v114_v45 }
 0x102   :  { %v352_v46 = vpop.eup %351 }
 0x103   :  { %307 = vmatmul.mubr.f32.vlgmr.msra.gmra.mrb[0].mxu1 %v352_v46 }
 0x1d6   :  { %v206_v48 = vpop.f32.mrb[0].mxu1 }
 0x1d7   :  { %v207_v49 = vadd.f32 %v228_v47, %v206_v48  ;;  %v308_v50 = vpop.f32.mrb[1].mxu1 }
 0x1d9   :  { %210 = vst [vmem:[#allocation2] sm:$0xff] %v207_v49 }
 0x1da   :  { %364 = shalt.err (!%p361_p4)
}
 0x1db   :  { %s365_s21 = scalar_lea.hbm %s521_s5, 128 }
 0x1dc   :  { %p366_p5 = scmp.ne.s32.totalorder %s521_s5, %s365_s21  ;;  %p369_p6 = scmp.lt.u32.totalorder %s365_s21, %s521_s5 }
 0x1de   :  { %p371_p7 = pnand %p369_p6, %p366_p5 }
 0x1e0   :  { %374 = shalt.err (!%p371_p7)
}
 0x1e1   :  { %220 = dma.vmem_to_hbm [thread:$0]  %s218_s19, 128, %s521_s5, [#allocation3]  }
 0x1e2   :  { %375 = dma.done.wait [#allocation3], 128  }
 0x1e3   :  { %376 = vsyncadd [#allocation3], 4294967168 }
 0x1e4   :  { %224 = vsyncpa [#allocation3], 1 }

</bundles_post_ra>
